<compile_context>
chip_gen: v7x
topology: tpu7x:2x2x1
jax: 0.10.0
libtpu: 0.0.40
codegen_flags: <defaults>
</compile_context>

<pallas_src>
import math

import jax
import jax.numpy as jnp
from jax.experimental import pallas as pl
from jax.experimental.pallas import tpu as pltpu

# ----------------------------- module config --------------------------------
N_GRAPHS = 8          # batch of independent graphs handled by one pallas_call
N_NODES = 32
IN_DIM = 16
OUT_DIM = 32
K = 2
ALPHA = 0.5
BETA = 1.0 - ALPHA
GRAPH_NORM = True
ACTIVATION = "relu"   # matches `activation=F.relu`
RESIDUAL = True
EDGE_P = 0.3          # density of the synthetic random graphs


# ------------------------------ Pallas kernel -------------------------------
def vgcn_kernel(a_ref, x_ref, an2_ref, w_ref, out_ref):
    # a_ref:   (N, N)        = ALPHA * D^-1/2 A D^-1/2   (norm + alpha pre-folded)
    # x_ref:   (N, IN+1)     = [x | 1]                   (bias column appended)
    # an2_ref: (N, 1)        = ALPHA * norm^2
    # w_ref:   (IN+1, 2*OUT) = [[W | res_W]; [b | res_b]]
    x = x_ref[...]
    A = a_ref[...]
    an2 = an2_ref[...]

    # dropout(p=0) == identity; fused (linear + bias) and (res_fc + bias):
    hc = jnp.dot(x, w_ref[...], preferred_element_type=jnp.float32)  # (N, 2*OUT)
    h = hc[:, :OUT_DIM]
    res = hc[:, OUT_DIM:]

    alpha_ri = an2 * h          # loop-invariant: alpha * (h0 * norm^2)
    h_pre = h

    # k propagation steps (static unroll; k is a constructor constant).
    # Original body: h = alpha*(norm*(A @ (norm*h))) + alpha*ri + (1-alpha)*h_pre
    # with norm & alpha folded into A it is one matmul + adds.
    for _ in range(K):
        h = (jnp.dot(A, h, preferred_element_type=jnp.float32)
             + alpha_ri + BETA * h_pre)
        h_pre = h

    if ACTIVATION == "relu":
        h = jnp.maximum(h, 0.0)

    if RESIDUAL:
        h = h + res

    out_ref[...] = h.astype(out_ref.dtype)


def vgcn_block(A, x, norm, W, b, res_W, res_b):
    """Batched forward: A [G,N,N], x [G,N,IN], norm [G,N,1] -> [G,N,OUT]."""
    G, N, _ = A.shape

    # ---- one-time algebraic folding in the wrapper (layout plumbing) ----
    # alpha * D^-1/2 A D^-1/2
    A_t = ALPHA * (norm * A * jnp.swapaxes(norm, -1, -2))            # [G,N,N]
    an2 = ALPHA * norm * norm                                        # [G,N,1]
    # fuse main + residual projections and their biases into one weight
    x_aug = jnp.concatenate([x, jnp.ones((G, N, 1), x.dtype)], axis=-1)   # [G,N,IN+1]
    W_aug = jnp.concatenate(
        [jnp.concatenate([W, res_W], axis=1),
         jnp.concatenate([b, res_b], axis=1)], axis=0)               # [IN+1, 2*OUT]

    return pl.pallas_call(
        vgcn_kernel,
        out_shape=jax.ShapeDtypeStruct((G, N, OUT_DIM), jnp.float32),
        grid_spec=pltpu.PrefetchScalarGridSpec(
            num_scalar_prefetch=0,
            grid=(G,),
            in_specs=[
                pl.BlockSpec((None, N, N), lambda g: (g, 0, 0)),
                pl.BlockSpec((None, N, IN_DIM + 1), lambda g: (g, 0, 0)),
                pl.BlockSpec((None, N, 1), lambda g: (g, 0, 0)),
                # shared weights: same block every grid step (stays resident)
                pl.BlockSpec((IN_DIM + 1, 2 * OUT_DIM), lambda g: (0, 0)),
            ],
            out_specs=pl.BlockSpec((None, N, OUT_DIM), lambda g: (g, 0, 0)),
        ),
        compiler_params=pltpu.CompilerParams(
            dimension_semantics=("parallel",)),   # v7x: split graphs across TCs
    )(A_t, x_aug, an2, W_aug)


# --------------------------- pure-JAX reference ------------------------------
def vgcn_reference(A, x, norm, W, b, res_W, res_b):
    """Faithful (un-refactored) transcription of the PyTorch forward, vmapped."""
    def single(Ag, xg, ng):
        h = xg @ W + b
        h_pre = h
        ri = h * ng * ng
        for _ in range(K):
            if GRAPH_NORM:
                h = h * ng
            h = Ag @ h
            if GRAPH_NORM:
                h = h * ng
            h = ALPHA * h + ALPHA * ri + (1.0 - ALPHA) * h_pre
            h_pre = h
        if ACTIVATION == "relu":
            h = jnp.maximum(h, 0.0)
        if RESIDUAL:
            h = h + (xg @ res_W + res_b)
        return h

    return jax.vmap(single)(A, x, norm)


# -------------------------- deterministic init -------------------------------
def init_params(key):
    k_w, k_rw = jax.random.split(key, 2)
    gain = math.sqrt(2.0) if ACTIVATION == "relu" else 1.0   # cal_gain(relu)

    # nn.init.xavier_uniform_ on Linear(in_dim, out_dim) weight, zero bias
    limit = gain * math.sqrt(6.0 / (IN_DIM + OUT_DIM))
    W = jax.random.uniform(k_w, (IN_DIM, OUT_DIM), jnp.float32, -limit, limit)
    b = jnp.zeros((1, OUT_DIM), jnp.float32)

    # res_fc: nn.init.xavier_normal_, zero bias
    std = gain * math.sqrt(2.0 / (IN_DIM + OUT_DIM))
    res_W = std * jax.random.normal(k_rw, (IN_DIM, OUT_DIM), jnp.float32)
    res_b = jnp.zeros((1, OUT_DIM), jnp.float32)
    return W, b, res_W, res_b


def build_graphs(key):
    # dense adjacency per graph: A[g, i, j] = 1.0 iff edge j -> i
    A = (jax.random.uniform(key, (N_GRAPHS, N_NODES, N_NODES)) < EDGE_P
         ).astype(jnp.float32)
    in_degs = A.sum(axis=2)                                   # in-degree per dst node
    norm = jnp.power(in_degs + 1.0, -0.5).reshape(N_GRAPHS, N_NODES, 1)
    return A, norm


# ----------------------------------- main ------------------------------------
if __name__ == "__main__":
    key = jax.random.PRNGKey(0)
    k_graph, k_feat, k_param = jax.random.split(key, 3)

    A, norm = build_graphs(k_graph)
    x = jax.random.normal(k_feat, (N_GRAPHS, N_NODES, IN_DIM), jnp.float32)
    W, b, res_W, res_b = init_params(k_param)

    out = vgcn_block(A, x, norm, W, b, res_W, res_b)
    out = jax.block_until_ready(out)

    ref = vgcn_reference(A, x, norm, W, b, res_W, res_b)
    assert out.shape == (N_GRAPHS, N_NODES, OUT_DIM)
    # tolerance covers f32 summation-order differences from the algebraic folding
    assert jnp.allclose(out, ref, rtol=1e-4, atol=1e-5), "mismatch vs reference"

    print("KERNEL_OK")
</pallas_src>

<mosaic_0001>
module attributes {stable_mosaic.version = 11 : i64} {
  func.func @vgcn_kernel(%arg0: i32, %arg1: memref<1x32x32xf32, #tpu.memory_space<vmem>>, %arg2: memref<1x32x17xf32, #tpu.memory_space<vmem>>, %arg3: memref<1x32x1xf32, #tpu.memory_space<vmem>>, %arg4: memref<17x64xf32, #tpu.memory_space<vmem>>, %arg5: memref<1x32x32xf32, #tpu.memory_space<vmem>>) attributes {dimension_semantics = [#tpu.dimension_semantics<parallel>], iteration_bounds = array<i64: 8>, scalar_prefetch = 0 : i64, scratch_operands = 0 : i64, tpu.core_type = #tpu.core_type<tc>, window_params = [{transform_indices = @transform_0, window_bounds = array<i64: 1, 32, 32>}, {transform_indices = @transform_1, window_bounds = array<i64: 1, 32, 17>}, {transform_indices = @transform_2, window_bounds = array<i64: 1, 32, 1>}, {pipeline_mode = #tpu.pipeline_mode<synchronous>, transform_indices = @transform_3, window_bounds = array<i64: 17, 64>}, {transform_indices = @transform_4, window_bounds = array<i64: 1, 32, 32>}]} {
    %c0 = arith.constant 0 : index
    %c0_0 = arith.constant 0 : index
    %c0_1 = arith.constant 0 : index
    %0 = vector.load %arg2[%c0, %c0_0, %c0_1] : memref<1x32x17xf32, #tpu.memory_space<vmem>>, vector<1x32x17xf32>
    %1 = vector.shape_cast %0 : vector<1x32x17xf32> to vector<32x17xf32>
    %c0_2 = arith.constant 0 : index
    %c0_3 = arith.constant 0 : index
    %c0_4 = arith.constant 0 : index
    %2 = vector.load %arg1[%c0_2, %c0_3, %c0_4] : memref<1x32x32xf32, #tpu.memory_space<vmem>>, vector<1x32x32xf32>
    %3 = vector.shape_cast %2 : vector<1x32x32xf32> to vector<32x32xf32>
    %c0_5 = arith.constant 0 : index
    %c0_6 = arith.constant 0 : index
    %c0_7 = arith.constant 0 : index
    %4 = vector.load %arg3[%c0_5, %c0_6, %c0_7] : memref<1x32x1xf32, #tpu.memory_space<vmem>>, vector<1x32x1xf32>
    %5 = vector.shape_cast %4 : vector<1x32x1xf32> to vector<32x1xf32>
    %c0_8 = arith.constant 0 : index
    %c0_9 = arith.constant 0 : index
    %6 = vector.load %arg4[%c0_8, %c0_9] : memref<17x64xf32, #tpu.memory_space<vmem>>, vector<17x64xf32>
    %cst = arith.constant dense<0.000000e+00> : vector<32x64xf32>
    %7 = tpu.matmul %1, %6, %cst {dimension_numbers = #tpu.dot_dimension_numbers<[1], [0], [0], [1], [0, 0, 1, 1], [], []>} : vector<32x17xf32>, vector<17x64xf32>, vector<32x64xf32> -> vector<32x64xf32>
    %8 = vector.extract_strided_slice %7 {offsets = [0, 0], sizes = [32, 32], strides = [1, 1]} : vector<32x64xf32> to vector<32x32xf32>
    %9 = vector.extract_strided_slice %7 {offsets = [0, 32], sizes = [32, 32], strides = [1, 1]} : vector<32x64xf32> to vector<32x32xf32>
    %10 = vector.broadcast %5 : vector<32x1xf32> to vector<32x32xf32>
    %11 = arith.mulf %10, %8 : vector<32x32xf32>
    %cst_10 = arith.constant dense<0.000000e+00> : vector<32x32xf32>
    %12 = tpu.matmul %3, %8, %cst_10 {dimension_numbers = #tpu.dot_dimension_numbers<[1], [0], [0], [1], [0, 0, 1, 1], [], []>} : vector<32x32xf32>, vector<32x32xf32>, vector<32x32xf32> -> vector<32x32xf32>
    %13 = arith.addf %12, %11 : vector<32x32xf32>
    %cst_11 = arith.constant 5.000000e-01 : f32
    %14 = vector.broadcast %cst_11 : f32 to vector<32x32xf32>
    %15 = arith.mulf %14, %8 : vector<32x32xf32>
    %16 = arith.addf %13, %15 : vector<32x32xf32>
    %cst_12 = arith.constant dense<0.000000e+00> : vector<32x32xf32>
    %17 = tpu.matmul %3, %16, %cst_12 {dimension_numbers = #tpu.dot_dimension_numbers<[1], [0], [0], [1], [0, 0, 1, 1], [], []>} : vector<32x32xf32>, vector<32x32xf32>, vector<32x32xf32> -> vector<32x32xf32>
    %18 = arith.addf %17, %11 : vector<32x32xf32>
    %cst_13 = arith.constant 5.000000e-01 : f32
    %19 = vector.broadcast %cst_13 : f32 to vector<32x32xf32>
    %20 = arith.mulf %19, %16 : vector<32x32xf32>
    %21 = arith.addf %18, %20 : vector<32x32xf32>
    %cst_14 = arith.constant 0.000000e+00 : f32
    %22 = vector.broadcast %cst_14 : f32 to vector<32x32xf32>
    %23 = arith.maximumf %21, %22 : vector<32x32xf32>
    %24 = arith.addf %23, %9 : vector<32x32xf32>
    %c0_15 = arith.constant 0 : index
    %c0_16 = arith.constant 0 : index
    %c0_17 = arith.constant 0 : index
    %25 = vector.load %arg5[%c0_15, %c0_16, %c0_17] : memref<1x32x32xf32, #tpu.memory_space<vmem>>, vector<1x32x32xf32>
    %26 = vector.shape_cast %25 : vector<1x32x32xf32> to vector<32x32xf32>
    %27 = vector.shape_cast %24 : vector<32x32xf32> to vector<1x32x32xf32>
    tpu.vector_store %arg5[%c0_15, %c0_16, %c0_17], %27 {strides = array<i32>} : memref<1x32x32xf32, #tpu.memory_space<vmem>>, vector<1x32x32xf32>,
    return
  }
  func.func @transform_0(%arg0: i32) -> (i32, i32, i32) {
    %c0_i32 = arith.constant 0 : i32
    %c0_i32_0 = arith.constant 0 : i32
    %c0_i32_1 = arith.constant 0 : i32
    return %arg0, %c0_i32, %c0_i32_0 : i32, i32, i32
  }
  func.func @transform_1(%arg0: i32) -> (i32, i32, i32) {
    %c0_i32 = arith.constant 0 : i32
    %c0_i32_0 = arith.constant 0 : i32
    %c0_i32_1 = arith.constant 0 : i32
    return %arg0, %c0_i32, %c0_i32_0 : i32, i32, i32
  }
  func.func @transform_2(%arg0: i32) -> (i32, i32, i32) {
    %c0_i32 = arith.constant 0 : i32
    %c0_i32_0 = arith.constant 0 : i32
    %c0_i32_1 = arith.constant 0 : i32
    return %arg0, %c0_i32, %c0_i32_0 : i32, i32, i32
  }
  func.func @transform_3(%arg0: i32) -> (i32, i32) {
    %c0_i32 = arith.constant 0 : i32
    %c0_i32_0 = arith.constant 0 : i32
    %c0_i32_1 = arith.constant 0 : i32
    return %c0_i32, %c0_i32_0 : i32, i32
  }
  func.func @transform_4(%arg0: i32) -> (i32, i32, i32) {
    %c0_i32 = arith.constant 0 : i32
    %c0_i32_0 = arith.constant 0 : i32
    %c0_i32_1 = arith.constant 0 : i32
    return %arg0, %c0_i32, %c0_i32_0 : i32, i32, i32
  }
}

</mosaic_0001>

<bundles_post_ra>
// kernel: tpu_custom_call.1
= control target key start
LH: loop header
LB: loop body
LE: loop exit
PB: predicated region body
PF: predicated region fallthrough
CT: control target
= control target key end

     0   :  { %9 = vsyncpa [#allocation3], 0  ;;  %s1103_s0 = inlined_call_operand.vmem [shape: f32[8,32,32], index: 0, kind: input, shape index: {}]   ;;  %s1104_s1 = inlined_call_operand.vmem [shape: f32[8,32,17], index: 1, kind: input, shape index: {}]   ;;  %s1105_s2 = inlined_call_operand.vmem [shape: f32[8,32,1], index: 2, kind: input, shape index: {}]   ;;  %s1106_s3 = inlined_call_operand.vmem [shape: f32[17,64], index: 3, kind: input, shape index: {}]   ;;  %s1107_s4 = inlined_call_operand.hbm [shape: f32[8,32,32], index: 4, kind: output, shape index: {}]  }
   0x1   :  { %11 = vsyncpa [#allocation3 + $0x1], 0  ;;  %s963_s15 = smov 0   ;;  %s965_s16 = smov 0  }
   0x2   :  { %s967_s17 = smov 0   ;;  %s969_s18 = smov 0  }
   0x3 LB: > { %s984_s19 = sadd.s32 4294967295, %s931_s18   ;;  %s704_s20 = sadd.s32 4294967294, %s931_s18   ;;  %s931_s18 = sphi %s969_s18, %s1113_s18   ;;  %s927_s17 = sphi %s967_s17, %s1112_s17   ;;  %s923_s16 = sphi %s965_s16, %s1111_s16   ;;  %s919_s15 = sphi %s963_s15, %s1110_s15  }
   0x4   : > { %s988_s21 = sadd.s32 1, %s931_s18   ;;  %s123_s22 = sadd.s32 1, %s927_s17 }
   0x5   : > { %s120_s23 = ssub.s32 %s931_s18, %s988_s21  ;;  %p133_p0 = scmp.ne.s32.totalorder %s927_s17, %s923_s16 }
   0x6   : > { %p121_p1 = scmp.eq.s32.totalorder %s120_s23, 0  ;;  %p134_p2 = scmp.eq.s32.totalorder %s984_s19, 7 }
   0x7   : > { %p139_p3 = scmp.ne.s32.totalorder %s923_s16, %s919_s15  ;;  %p140_p4 = scmp.eq.s32.totalorder %s704_s20, 7 }
   0x8   : > { %s999_s24 = scalar_select %p121_p1, %s927_s17, %s123_s22  }
   0x9   : > { %p1001_p5 = por %p134_p2, %p133_p0  ;;  %p1005_p6 = por %p140_p4, %p139_p3 }
   0xa   : > { %p707_p7 = scmp.ge.s32.totalorder %s931_s18, 1  ;;  %p185_p8 = scmp.lt.s32.totalorder %s931_s18, 9 }
   0xc   : > { %p186_p9 = pnand %p707_p7, %p185_p8 }
   0xd   : > { %v248_v0 = vld [vmem:[%s1106_s3] sm:$0xff] (!%p186_p9)  ;;  %v249_v1 = vld [vmem:[%s1106_s3 + $0x8] sm:$0xff] (!%p186_p9)  ;;  %p221_p10 = scmp.lt.s32.totalorder (!%p186_p9), %s984_s19, 7  ;;  %v250_v3 = vld [vmem:[%s1106_s3 + $0x10] sm:$0x1] (!%p186_p9)  ;;  %vm264_vm0 = vcmask (!%p186_p9), 1040384  }
   0xe   : > { %189 = sbr.rel (%p186_p9) target bundleno = 713 (0x2c9), region = 36  ;;  %v800_v2 = vpack.c.bf16 (!%p186_p9), %v249_v1, %v248_v0  ;;  %v933_v4 = vmov (!%p186_p9), 0   ;;  %vm251_vm1 = vcmask (!%p186_p9), 138240   ;;  %vm377_vm2 = vcmask (!%p186_p9), 261120   ;;  %s934_s27 = smov (!%p186_p9), 96  }
   0xf   : > { %867 = vset.pattern.permute.xlu0 (!%p186_p9), %v933_v4  ;;  %868 = vset.pattern.permute.xlu1 (!%p186_p9), %v933_v4  ;;  %s218_s28 = sand.u32 (!%p186_p9), 1, %s923_s16   ;;  %s736_s30 = sshll.u32 (!%p186_p9), %s984_s19, 9 }
  0x10   : > { %801 = vmatprep.subr.bf16.mxu0 (!%p186_p9), %v800_v2  ;;  %s708_s29 = sshll.u32 (!%p186_p9), %s218_s28, 5  ;;  %s1052_s9 = scalar_lea.hbm (!%p186_p9), %s1107_s4, %s736_s30 }
  0x11   : > { %803 = vmatpush3.bf16.msra.mxu0 (!%p186_p9), %v800_v2  ;;  %s220_s5 = scalar_lea.vmem (!%p186_p9), [#allocation2], %s708_s29 }
  0x12   : > { %764 = vmatprep.subr.msk.mxu0 (!%p186_p9), %vm264_vm0, %v250_v3  ;;  %s618_s6 = sshll.u32 (!%p186_p9), %s220_s5, 4  ;;  %s1054_s6 = int_to_ptr.vmem [resolvable:$true] %s618_s6 }
  0x13   : > { %s869_s10 = scalar_lea.vmem (!%p186_p9), %s1054_s6, 512 }
  0x14   : > { %p870_p11 = scmp.ne.s32.totalorder (!%p186_p9), %s1054_s6, %s869_s10 }
  0x15   : > { %s222_s7 = scalar_select %p221_p10, %s984_s19, 7  ;;  %765 = vmatpush3.msk.msra.mxu0 %vm264_vm0, %v250_v3 }
  0x16   : > { %s1062_s19 = scalar_lea.sflag [#allocation3], %s218_s28  ;;  %p871_p12 = pnand %p870_p11, %p1001_p5 }
  0x17   : > { %s733_s8 = sshll.u32 %s222_s7, 5 }
  0x18   : > { %s230_s11 = scalar_lea.vmem %s1104_s1, %s733_s8  ;;  %s235_s14 = scalar_lea.vmem %s1105_s2, %s733_s8 }
  0x19   : > { %v236_v5 = vld [vmem:[%s230_s11] sm:$0xff]  ;;  %v237_v6 = vld [vmem:[%s230_s11 + $0x8] sm:$0xff]  ;;  %v238_v7 = vld [vmem:[%s230_s11 + $0x10] sm:$0xff]  ;;  %s225_s23 = scalar_lea.vmem %s1103_s0, %s733_s8  ;;  %p872_p13 = pneg %p871_p12 }
  0x1a   : > { %766 = vmatprep.mubr.msk.f32.mxu0 %vm251_vm1, %v236_v5  ;;  %v244_v8 = vld [vmem:[%s235_s14] sm:$0xff]  ;;  %v246_v9 = vld [vmem:[%s235_s14 + $0x10] sm:$0xff]  ;;  %v245_v10 = vld [vmem:[%s235_s14 + $0x8] sm:$0xff] }
  0x1b   : > { %355 = vperm.xlu0 %867, %v244_v8   ;;  %767 = vmatmul.mubr.msk.f32.vlgmr.msra.gmra.mrb[0].mxu0 %vm251_vm1, %v237_v6  ;;  %v239_v11 = vld [vmem:[%s230_s11 + $0x18] sm:$0xff]  ;;  %v240_v13 = vld [vmem:[%s225_s23] sm:$0xff]  ;;  %v241_v20 = vld [vmem:[%s225_s23 + $0x8] sm:$0xff]  ;;  %s935_s11 = smov [#allocation2]  }
  0x1c   : > { %365 = vperm.xlu1 %868, %v246_v9   ;;  %769 = vmatprep.mubr.msk.f32.mxu0 %vm251_vm1, %v238_v7  ;;  %v247_v12 = vld [vmem:[%s235_s14 + $0x18] sm:$0xff]  ;;  %v242_v21 = vld [vmem:[%s225_s23 + $0x10] sm:$0xff]  ;;  %s873_s12 = sshll.u32 %s935_s11, 4  ;;  %s874_s12 = int_to_ptr.vmem [resolvable:$false] %s873_s12 }
  0x1d   : > { %780 = vmatprep.mubr.msk.f32.mxu1 %vm377_vm2, %v240_v13  ;;  %v243_v22 = vld [vmem:[%s225_s23 + $0x18] sm:$0xff]  ;;  %s875_s13 = scalar_lea.vmem %s874_s12, 1024  ;;  %p876_p0 = scmp.lt.s32.totalorder %s1054_s6, %s874_s12 }
  0x1e   : > { %p877_p1 = scmp.lt.s32.totalorder %s875_s13, %s869_s10 }
  0x1f   : > { %360 = vperm.xlu0 %867, %v245_v10   ;;  %770 = vmatmul.mubr.msk.f32.gmra.mrb[2].mxu0 %vm251_vm1, %v239_v11 }
  0x20   : > { %370 = vperm.xlu1 %868, %v247_v12   ;;  %794 = vmatprep.mubr.msk.f32.mxu0 %vm377_vm2, %v240_v13  ;;  %p878_p2 = por %p877_p1, %p876_p0 }
  0x22   : > { %p879_p3 = pnand %p878_p2, %p872_p13 }
  0x9a   : > { %v356_v23 = vpop.permute.xlu0 %355 }
  0x9b   : > { %v366_v24 = vpop.permute.xlu1 %365 }
  0x9e   : > { %v361_v25 = vpop.permute.xlu0 %360 }
  0x9f   : > { %v371_v27 = vpop.permute.xlu1 %370 }
  0xee   : > { %v768_v14 = vpop.f32.mrb[0].mxu0 }
  0xef   : > { %586 = vrot.lane.b32.xlu1 %v768_v14, %s934_s27  ;;  %v334_v15 = vpop.f32.mrb[1].mxu0  ;;  %v374_v26 = vmul.f32 %v768_v14, %v361_v25  ;;  %v476_v31 = vmul.f32 0.5, %v768_v14 }
  0xf0   : > { %584 = vrot.lane.b32.xlu0 %v334_v15, %s934_s27  ;;  %v804_v16 = vpack.c.bf16 %v768_v14, %v334_v15  ;;  %v373_v29 = vmul.f32 %v356_v23, %v334_v15  ;;  %v475_v34 = vmul.f32 0.5, %v334_v15 }
  0xf2   : > { %v771_v17 = vpop.f32.mrb[2].mxu0  ;;  %805 = vmatprep.subr.bf16.mxu1 %v804_v16 }
  0xf3   : > { %807 = vmatpush3.bf16.msra.mxu1 %v804_v16  ;;  %590 = vrot.lane.b32.xlu1 %v771_v17, %s934_s27  ;;  %v344_v18 = vpop.f32.mrb[3].mxu0  ;;  %v376_v36 = vmul.f32 %v771_v17, %v371_v27  ;;  %v478_v41 = vmul.f32 0.5, %v771_v17 }
  0xf4   : > { %588 = vrot.lane.b32.xlu0 %v344_v18, %s934_s27  ;;  %v808_v19 = vpack.c.bf16 %v771_v17, %v344_v18  ;;  %v375_v39 = vmul.f32 %v366_v24, %v344_v18  ;;  %v477_v45 = vmul.f32 0.5, %v344_v18 }
  0xf6   : > { %809 = vmatprep.subr.bf16.mxu1 %v808_v19 }
  0xf7   : > { %811 = vmatpush3.bf16.msra.mxu1 %v808_v19 }
  0xfa   : > { %781 = vmatmul.mubr.msk.f32.vlgmr.msra.gmra.mrb[0].mxu1 %vm377_vm2, %v241_v20 }
  0xfb   : > { %783 = vmatprep.mubr.msk.f32.mxu1 %vm377_vm2, %v242_v21 }
  0xfe   : > { %784 = vmatmul.mubr.msk.f32.gmra.mrb[2].mxu1 %vm377_vm2, %v243_v22 }
  0xff   : > { %797 = vmatprep.mubr.msk.f32.mxu1 %vm377_vm2, %v242_v21 }
 0x161   : > { %v587_v49 = vpop.permute.xlu1 %586 }
 0x162   : > { %v585_v50 = vpop.permute.xlu0 %584 }
 0x165   : > { %v591_v5 = vpop.permute.xlu1 %590 }
 0x166   : > { %v589_v8 = vpop.permute.xlu0 %588 }
 0x1cd   : > { %v782_v28 = vpop.f32.mrb[0].mxu1 }
 0x1ce   : > { %v462_v30 = vadd.f32 %v782_v28, %v374_v26  ;;  %v456_v32 = vpop.f32.mrb[1].mxu1 }
 0x1cf   : > { %v457_v33 = vadd.f32 %v456_v32, %v373_v29 }
 0x1d0   : > { %v480_v35 = vadd.f32 %v476_v31, %v462_v30 }
 0x1d1   : > { %v479_v37 = vadd.f32 %v475_v34, %v457_v33  ;;  %v785_v38 = vpop.f32.mrb[2].mxu1 }
 0x1d2   : > { %v472_v40 = vadd.f32 %v785_v38, %v376_v36  ;;  %v466_v42 = vpop.f32.mrb[3].mxu1  ;;  %v569_v54 = vmul.f32 0.5, %v480_v35 }
 0x1d3   : > { %v812_v43 = vpack.c.bf16 %v480_v35, %v479_v37  ;;  %v467_v44 = vadd.f32 %v466_v42, %v375_v39  ;;  %v568_v60 = vmul.f32 0.5, %v479_v37 }
 0x1d4   : > { %v482_v46 = vadd.f32 %v478_v41, %v472_v40 }
 0x1d5   : > { %v481_v47 = vadd.f32 %v477_v45, %v467_v44  ;;  %813 = vmatprep.subr.bf16.mxu0 %v812_v43  ;;  %820 = vmatprep.subr.bf16.mxu1 %v812_v43 }
 0x1d6   : > { %815 = vmatpush3.bf16.msra.mxu0 %v812_v43  ;;  %822 = vmatpush3.bf16.msra.mxu1 %v812_v43  ;;  %v571_v56 = vmul.f32 0.5, %v482_v46 }
 0x1d7   : > { %v816_v48 = vpack.c.bf16 %v482_v46, %v481_v47  ;;  %v570_v62 = vmul.f32 0.5, %v481_v47 }
 0x1d9   : > { %817 = vmatprep.subr.bf16.mxu0 %v816_v48  ;;  %821 = vmatprep.subr.bf16.mxu1 %v816_v48 }
 0x1da   : > { %819 = vmatpush3.bf16.msra.mxu0 %v816_v48  ;;  %823 = vmatpush3.bf16.msra.mxu1 %v816_v48 }
 0x1dd   : > { %795 = vmatmul.mubr.msk.f32.vlgmr.msra.gmra.mrb[4].mxu0 %vm377_vm2, %v241_v20  ;;  %798 = vmatmul.mubr.msk.f32.vlgmr.msra.gmra.mrb[4].mxu1 %vm377_vm2, %v243_v22 }
 0x2b0   : > { %v796_v51 = vpop.f32.mrb[4].mxu0  ;;  %v799_v52 = vpop.f32.mrb[4].mxu1 }
 0x2b1   : > { %v555_v53 = vadd.f32 %v796_v51, %v374_v26  ;;  %v565_v55 = vadd.f32 %v799_v52, %v376_v36  ;;  %v549_v57 = vpop.f32.mrb[5].mxu0  ;;  %v559_v58 = vpop.f32.mrb[5].mxu1 }
 0x2b2   : > { %v550_v59 = vadd.f32 %v549_v57, %v373_v29  ;;  %v560_v61 = vadd.f32 %v559_v58, %v375_v39 }
 0x2b3   : > { %v573_v63 = vadd.f32 %v569_v54, %v555_v53  ;;  %v575_v0 = vadd.f32 %v571_v56, %v565_v55 }
 0x2b4   : > { %v572_v1 = vadd.f32 %v568_v60, %v550_v59  ;;  %v574_v2 = vadd.f32 %v570_v62, %v560_v61 }
 0x2b5   : > { %v577_v3 = vmax.f32 %v573_v63, 0.0  ;;  %v579_v4 = vmax.f32 %v575_v0, 0.0 }
 0x2b6   : > { %v576_v6 = vmax.f32 %v572_v1, 0.0  ;;  %v578_v7 = vmax.f32 %v574_v2, 0.0 }
 0x2b7   : > { %v597_v9 = vadd.f32 %v587_v49, %v577_v3  ;;  %v599_v10 = vadd.f32 %v591_v5, %v579_v4 }
 0x2b8   : > { %v596_v11 = vadd.f32 %v585_v50, %v576_v6  ;;  %v598_v12 = vadd.f32 %v589_v8, %v578_v7 }
 0x2b9   : > { %601 = vst.msk [vmem:[%s220_s5 + $0x8] sm:$0xff] %vm377_vm2, %v597_v9  ;;  %603 = vst.msk [vmem:[%s220_s5 + $0x18] sm:$0xff] %vm377_vm2, %v599_v10 }
 0x2ba   : > { %600 = vst.msk [vmem:[%s220_s5] sm:$0xff] %vm377_vm2, %v596_v11  ;;  %602 = vst.msk [vmem:[%s220_s5 + $0x10] sm:$0xff] %vm377_vm2, %v598_v12 }
 0x2bb   : > { %882 = shalt.err (!%p879_p3)
}
 0x2bc   : > { %s883_s14 = scalar_lea.hbm %s1052_s9, 512  ;;  %s887_s23 = scalar_lea.hbm %s1107_s4, 4096 }
 0x2bd   : > { %p884_p4 = scmp.ne.s32.totalorder %s1052_s9, %s883_s14  ;;  %p888_p9 = scmp.lt.u32.totalorder %s1052_s9, %s1107_s4 }
 0x2be   : > { %p889_p10 = scmp.lt.u32.totalorder %s887_s23, %s883_s14  ;;  %p891_p12 = scmp.lt.u32.totalorder %s883_s14, %s1052_s9 }
 0x2bf   : > { %p885_p7 = pnand %p884_p4, %p1001_p5 }
 0x2c0   : > { %p890_p11 = por %p889_p10, %p888_p9 }
 0x2c1   : > { %p886_p8 = pneg %p885_p7 }
 0x2c2   : > { %p892_p13 = por %p891_p12, %p890_p11 }
 0x2c4   : > { %p893_p0 = pnand %p892_p13, %p886_p8 }
 0x2c6   : > { %896 = shalt.err (!%p893_p0)
}
 0x2c7   : > { %s936_s29 = smov 128   ;;  %s937_s30 = smov 8  }
 0x2c8   : > { %824 = dma.vmem_to_hbm [thread:$0]  (%p1001_p5), %s1054_s6, 512, %s1052_s9, %s1062_s19, %s936_s29, %s936_s29, %s937_s30  }
 0x2c9 PF: > { %p830_p1 = scmp.ge.s32.totalorder %s931_s18, 2  ;;  %s633_s5 = sand.u32 1, %s919_s15  }
 0x2ca   : > { %s634_s7 = scalar_lea.sflag [#allocation3], %s633_s5 }
 0x2cb   : > { %p827_p2 = pnand %p830_p1, %p1005_p6 }
 0x2cd   : > { %914 = dma.done.wait (!%p827_p2), %s634_s7, 512  }
 0x2ce   : > { %916 = vsyncadd (!%p827_p2), %s634_s7, 4294966784  ;;  %p14_p3 = scmp.ge.s32.totalorder %s988_s21, 10   ;;  %s1110_s15 = smov %s923_s16 }
 0x2cf   : > { %s1111_s16 = smov %s927_s17  ;;  %s1112_s17 = smov %s999_s24 }
 0x2d0   : > { %s1113_s18 = smov %s988_s21  ;;  %16 = sbr.rel (!%p14_p3) target bundleno = 3 (0x3), region = 77 }
 0x2d7   :  { %639 = vsyncpa [#allocation3], 1 }
 0x2d8   :  { %641 = vsyncpa [#allocation3 + $0x1], 1 }

</bundles_post_ra>
